<compile_context>
chip_gen: v5e
topology: v5e:2x2
jax: 0.10.0
libtpu: 0.0.40
codegen_flags: <defaults>
</compile_context>

<pallas_src>
import functools

import jax
import jax.numpy as jnp
from jax.experimental import pallas as pl
from jax.experimental.pallas import tpu as pltpu


# ----------------------------- Pallas kernel -------------------------------


def _lucid_kernel(xf_ref, wt_ref, b1_ref, w2_ref, b2_ref, o_ref, *, slab):
    """Whole LUCID forward for one batch tile.

    xf_ref:  (TILE_N, C_in*L)      VMEM  flattened input tile
    wt_ref:  (C_in*L, 2*slab)      VMEM  Toeplitz conv weight, even|odd slabs
    b1_ref:  (1, slab)             VMEM  conv bias in pooled-feature order
    w2_ref:  (slab, dim_y)         VMEM  FC weight (rows zero-padded to slab)
    b2_ref:  (1, dim_y)            VMEM
    o_ref:   (TILE_N, dim_y)       VMEM
    """
    # Conv1d for the whole tile: ONE MXU matmul (lane axis = 2*slab = 512).
    conv = jnp.dot(xf_ref[...], wt_ref[...],
                   preferred_element_type=jnp.float32)       # (TILE_N, 2*slab)

    # MaxPool1d(2): even/odd pool taps are the two vreg-aligned halves of the
    # matmul value -> pure VPU max, no scratch, no strided loads.
    pooled = jnp.maximum(conv[:, :slab], conv[:, slab:])     # (TILE_N, slab)

    # Conv bias (identical for both taps, so added after the max) + ReLU.
    pooled = jnp.maximum(pooled + b1_ref[...], 0.0)

    # Flatten (already in torch order) + Linear (ONE MXU matmul) + Sigmoid.
    logits = jnp.dot(pooled, w2_ref[...],
                     preferred_element_type=jnp.float32) + b2_ref[...]
    o_ref[...] = jax.nn.sigmoid(logits)                      # single 2-D store


# --------------------- parameter preparation (hoisted) -----------------------


def prepare_lucid_params(w1, b1, w2, b2, *, L, pool=2):
    """One-time weight re-layout (pure layout/zero-fill; no input compute).

    w1: (C_out, C_in, K); b1: (C_out,); w2: (dim_y, C_out*L_pool); b2: (dim_y,)
    Returns (w_toep, b1_slab, w2_pad, b2_r) with:
      w_toep : (C_in*L, 2*SLAB)  even-tap columns then odd-tap columns,
               each slab zero-padded from C_out*L_pool to SLAB (mult. of 128)
      b1_slab: (1, SLAB)         bias in pooled-feature order (o*L_pool + j)
      w2_pad : (SLAB, dim_y)     FC weight transposed, rows zero-padded
      b2_r   : (1, dim_y)
    """
    C_out, C_in, K = w1.shape
    L_out = L - K + 1
    assert pool == 2 and L_out % pool == 0, (
        "even/odd slab pooling needs pool=2 and even L_out")
    L_pool = L_out // pool
    flat = C_out * L_pool
    slab = ((flat + 127) // 128) * 128                        # 224 -> 256

    # Dense Toeplitz map: w_full[c, i, o, l] = w1[o, c, i-l] for 0 <= i-l < K.
    i_idx = jnp.arange(L)
    l_idx = jnp.arange(L_out)
    k_mat = i_idx[:, None] - l_idx[None, :]                   # (L, L_out)
    valid = (k_mat >= 0) & (k_mat < K)
    w_g = jnp.where(valid[None, None, :, :],
                    w1[:, :, jnp.clip(k_mat, 0, K - 1)],      # (C_out,C_in,L,L_out)
                    0.0)
    w_full = jnp.transpose(w_g, (1, 2, 0, 3))                 # (C_in,L,C_out,L_out)

    def slabify(part):                                        # (C_in,L,C_out,L_pool)
        m = part.reshape(C_in * L, flat)
        return jnp.pad(m, ((0, 0), (0, slab - flat)))

    w_even = slabify(w_full[..., 0::2])                       # taps l = 2j
    w_odd = slabify(w_full[..., 1::2])                        # taps l = 2j+1
    w_toep = jnp.concatenate([w_even, w_odd], axis=1)         # (C_in*L, 2*slab)

    b1_slab = jnp.pad(jnp.repeat(b1, L_pool), (0, slab - flat))[None, :]
    w2_pad = jnp.pad(w2.T, ((0, slab - flat), (0, 0)))        # (slab, dim_y)
    b2_r = b2[None, :]
    return (w_toep.astype(jnp.float32), b1_slab.astype(jnp.float32),
            w2_pad.astype(jnp.float32), b2_r.astype(jnp.float32))


# ------------------------------- forward -------------------------------------


@functools.partial(jax.jit, static_argnames=("tile_n",))
def lucid_forward(x, w_toep, b1_slab, w2_pad, b2_r, *, tile_n=None):
    """x: (N, C_in, L) f32; prepared params from prepare_lucid_params."""
    N, C_in, L = x.shape
    kdim, conv_w = w_toep.shape                               # (C_in*L, 2*slab)
    slab, dim_y = w2_pad.shape
    assert conv_w == 2 * slab and kdim == C_in * L

    xf = x.reshape(N, kdim)                                   # layout plumbing

    if tile_n is None:
        # 256 fills the v6e/v7x 256-row MXU; use tile_n=128 on v5e.
        tile_n = N if N <= 256 else 256
    grid = (pl.cdiv(N, tile_n),)

    kernel = functools.partial(_lucid_kernel, slab=slab)

    cost = pl.CostEstimate(
        flops=2 * N * kdim * conv_w + 2 * N * slab * dim_y,
        transcendentals=N * dim_y,
        bytes_accessed=4 * (xf.size + w_toep.size + b1_slab.size
                            + w2_pad.size + b2_r.size + N * dim_y),
    )

    grid_spec = pltpu.PrefetchScalarGridSpec(
        num_scalar_prefetch=0,
        grid=grid,
        in_specs=[
            # activations: streamed per batch tile
            pl.BlockSpec((tile_n, kdim), lambda i: (i, 0)),
            # weights / biases: constant index_map -> VMEM-resident, no re-DMA
            pl.BlockSpec((kdim, conv_w), lambda i: (0, 0)),
            pl.BlockSpec((1, slab), lambda i: (0, 0)),
            pl.BlockSpec((slab, dim_y), lambda i: (0, 0)),
            pl.BlockSpec((1, dim_y), lambda i: (0, 0)),
        ],
        out_specs=pl.BlockSpec((tile_n, dim_y), lambda i: (i, 0)),
    )

    return pl.pallas_call(
        kernel,
        out_shape=jax.ShapeDtypeStruct((N, dim_y), jnp.float32),
        grid_spec=grid_spec,
        compiler_params=pltpu.CompilerParams(
            dimension_semantics=("parallel",)),
        cost_estimate=cost,
    )(xf, w_toep, b1_slab, w2_pad, b2_r)


# --------------------------- pure-JAX reference ------------------------------


def lucid_reference(x, w1, b1, w2, b2, *, pool=2):
    N, C_in, L = x.shape
    C_out, _, K = w1.shape
    L_out = L - K + 1
    L_pool = L_out // pool
    y = jnp.zeros((N, C_out, L_out), jnp.float32)
    for k in range(K):
        y = y + jnp.einsum('oc,ncl->nol', w1[:, :, k], x[:, :, k:k + L_out])
    y = y + b1[None, :, None]
    y = jnp.maximum(y, 0.0)
    y = y[:, :, :L_pool * pool].reshape(N, C_out, L_pool, pool).max(-1)
    z = y.reshape(N, C_out * L_pool)
    logits = z @ w2.T + b2
    return jax.nn.sigmoid(logits)


# ---------------------------------- main -------------------------------------


if __name__ == "__main__":
    N, C_IN, L = 2, 4, 16
    C_OUT, K, POOL = 32, 3, 2
    L_OUT = L - K + 1           # 14
    L_POOL = L_OUT // POOL      # 7
    FLAT = C_OUT * L_POOL       # 224
    DIM_Y = 2

    key = jax.random.PRNGKey(0)
    kx, k1, k2, k3, k4 = jax.random.split(key, 5)

    # Deterministic, PyTorch-default-style (uniform +/- 1/sqrt(fan_in)) init.
    b_conv = 1.0 / jnp.sqrt(jnp.float32(C_IN * K))
    b_fc = 1.0 / jnp.sqrt(jnp.float32(FLAT))
    x = jax.random.normal(kx, (N, C_IN, L), jnp.float32)
    w1 = jax.random.uniform(k1, (C_OUT, C_IN, K), jnp.float32, -b_conv, b_conv)
    b1 = jax.random.uniform(k2, (C_OUT,), jnp.float32, -b_conv, b_conv)
    w2 = jax.random.uniform(k3, (DIM_Y, FLAT), jnp.float32, -b_fc, b_fc)
    b2 = jax.random.uniform(k4, (DIM_Y,), jnp.float32, -b_fc, b_fc)

    # Weight re-layouts hoisted out of the forward (done once).
    params = prepare_lucid_params(w1, b1, w2, b2, L=L, pool=POOL)
    params = jax.tree_util.tree_map(jax.block_until_ready, params)

    out = lucid_forward(x, *params)
    out = jax.block_until_ready(out)

    ref = lucid_reference(x, w1, b1, w2, b2, pool=POOL)
    assert out.shape == (N, DIM_Y)
    assert jnp.allclose(out, ref, atol=5e-4, rtol=5e-4), (out, ref)

    # TODO(synk): CrossEntropyLoss / Adam / train() are training-time pieces,
    # not part of forward(); intentionally not implemented as kernels.
    print("KERNEL_OK")
</pallas_src>

<mosaic_0001>
module attributes {stable_mosaic.version = 11 : i64} {
  func.func @_lucid_kernel(%arg0: i32, %arg1: memref<2x64xf32, #tpu.memory_space<vmem>>, %arg2: memref<64x512xf32, #tpu.memory_space<vmem>>, %arg3: memref<1x256xf32, #tpu.memory_space<vmem>>, %arg4: memref<256x2xf32, #tpu.memory_space<vmem>>, %arg5: memref<1x2xf32, #tpu.memory_space<vmem>>, %arg6: memref<2x2xf32, #tpu.memory_space<vmem>>) attributes {dimension_semantics = [#tpu.dimension_semantics<parallel>], iteration_bounds = array<i64: 1>, scalar_prefetch = 0 : i64, scratch_operands = 0 : i64, tpu.core_type = #tpu.core_type<tc>, window_params = [{transform_indices = @transform_0, window_bounds = array<i64: 2, 64>}, {pipeline_mode = #tpu.pipeline_mode<synchronous>, transform_indices = @transform_1, window_bounds = array<i64: 64, 512>}, {pipeline_mode = #tpu.pipeline_mode<synchronous>, transform_indices = @transform_2, window_bounds = array<i64: 1, 256>}, {pipeline_mode = #tpu.pipeline_mode<synchronous>, transform_indices = @transform_3, window_bounds = array<i64: 256, 2>}, {pipeline_mode = #tpu.pipeline_mode<synchronous>, transform_indices = @transform_4, window_bounds = array<i64: 1, 2>}, {transform_indices = @transform_5, window_bounds = array<i64: 2, 2>}]} {
    %c0 = arith.constant 0 : index
    %c0_0 = arith.constant 0 : index
    %0 = vector.load %arg1[%c0, %c0_0] : memref<2x64xf32, #tpu.memory_space<vmem>>, vector<2x64xf32>
    %c0_1 = arith.constant 0 : index
    %c0_2 = arith.constant 0 : index
    %1 = vector.load %arg2[%c0_1, %c0_2] : memref<64x512xf32, #tpu.memory_space<vmem>>, vector<64x512xf32>
    %cst = arith.constant dense<0.000000e+00> : vector<2x512xf32>
    %2 = tpu.matmul %0, %1, %cst {dimension_numbers = #tpu.dot_dimension_numbers<[1], [0], [0], [1], [0, 0, 1, 1], [], []>} : vector<2x64xf32>, vector<64x512xf32>, vector<2x512xf32> -> vector<2x512xf32>
    %3 = vector.extract_strided_slice %2 {offsets = [0, 0], sizes = [2, 256], strides = [1, 1]} : vector<2x512xf32> to vector<2x256xf32>
    %4 = vector.extract_strided_slice %2 {offsets = [0, 256], sizes = [2, 256], strides = [1, 1]} : vector<2x512xf32> to vector<2x256xf32>
    %5 = arith.maximumf %3, %4 : vector<2x256xf32>
    %c0_3 = arith.constant 0 : index
    %c0_4 = arith.constant 0 : index
    %6 = vector.load %arg3[%c0_3, %c0_4] : memref<1x256xf32, #tpu.memory_space<vmem>>, vector<1x256xf32>
    %7 = vector.broadcast %6 : vector<1x256xf32> to vector<2x256xf32>
    %8 = arith.addf %5, %7 : vector<2x256xf32>
    %cst_5 = arith.constant 0.000000e+00 : f32
    %9 = vector.broadcast %cst_5 : f32 to vector<2x256xf32>
    %10 = arith.maximumf %8, %9 : vector<2x256xf32>
    %c0_6 = arith.constant 0 : index
    %c0_7 = arith.constant 0 : index
    %11 = vector.load %arg4[%c0_6, %c0_7] : memref<256x2xf32, #tpu.memory_space<vmem>>, vector<256x2xf32>
    %cst_8 = arith.constant dense<0.000000e+00> : vector<2x2xf32>
    %12 = tpu.matmul %10, %11, %cst_8 {dimension_numbers = #tpu.dot_dimension_numbers<[1], [0], [0], [1], [0, 0, 1, 1], [], []>} : vector<2x256xf32>, vector<256x2xf32>, vector<2x2xf32> -> vector<2x2xf32>
    %c0_9 = arith.constant 0 : index
    %c0_10 = arith.constant 0 : index
    %13 = vector.load %arg5[%c0_9, %c0_10] : memref<1x2xf32, #tpu.memory_space<vmem>>, vector<1x2xf32>
    %14 = vector.broadcast %13 : vector<1x2xf32> to vector<2x2xf32>
    %15 = arith.addf %12, %14 : vector<2x2xf32>
    %16 = arith.negf %15 : vector<2x2xf32>
    %17 = math.exp %16 : vector<2x2xf32>
    %cst_11 = arith.constant 1.000000e+00 : f32
    %18 = vector.broadcast %cst_11 : f32 to vector<2x2xf32>
    %19 = arith.addf %18, %17 : vector<2x2xf32>
    %20 = arith.divf %18, %19 : vector<2x2xf32>
    %c0_12 = arith.constant 0 : index
    %c0_13 = arith.constant 0 : index
    %21 = vector.load %arg6[%c0_12, %c0_13] : memref<2x2xf32, #tpu.memory_space<vmem>>, vector<2x2xf32>
    tpu.vector_store %arg6[%c0_12, %c0_13], %20 {strides = array<i32>} : memref<2x2xf32, #tpu.memory_space<vmem>>, vector<2x2xf32>,
    return
  }
  func.func @transform_0(%arg0: i32) -> (i32, i32) {
    %c0_i32 = arith.constant 0 : i32
    %c0_i32_0 = arith.constant 0 : i32
    return %arg0, %c0_i32 : i32, i32
  }
  func.func @transform_1(%arg0: i32) -> (i32, i32) {
    %c0_i32 = arith.constant 0 : i32
    %c0_i32_0 = arith.constant 0 : i32
    %c0_i32_1 = arith.constant 0 : i32
    return %c0_i32, %c0_i32_0 : i32, i32
  }
  func.func @transform_2(%arg0: i32) -> (i32, i32) {
    %c0_i32 = arith.constant 0 : i32
    %c0_i32_0 = arith.constant 0 : i32
    %c0_i32_1 = arith.constant 0 : i32
    return %c0_i32, %c0_i32_0 : i32, i32
  }
  func.func @transform_3(%arg0: i32) -> (i32, i32) {
    %c0_i32 = arith.constant 0 : i32
    %c0_i32_0 = arith.constant 0 : i32
    %c0_i32_1 = arith.constant 0 : i32
    return %c0_i32, %c0_i32_0 : i32, i32
  }
  func.func @transform_4(%arg0: i32) -> (i32, i32) {
    %c0_i32 = arith.constant 0 : i32
    %c0_i32_0 = arith.constant 0 : i32
    %c0_i32_1 = arith.constant 0 : i32
    return %c0_i32, %c0_i32_0 : i32, i32
  }
  func.func @transform_5(%arg0: i32) -> (i32, i32) {
    %c0_i32 = arith.constant 0 : i32
    %c0_i32_0 = arith.constant 0 : i32
    return %arg0, %c0_i32 : i32, i32
  }
}

</mosaic_0001>

<bundles_post_ra>
// kernel: lucid_forward.1
= control target key start
LH: loop header
LB: loop body
LE: loop exit
PB: predicated region body
PF: predicated region fallthrough
CT: control target
= control target key end

     0   :  { %vm54_vm0 = vcmask 523264   ;;  %s545_s0 = inlined_call_operand.vmem [shape: f32[2,64], index: 0, kind: input, shape index: {}]   ;;  %s546_s1 = inlined_call_operand.vmem [shape: f32[64,512], index: 1, kind: input, shape index: {}]   ;;  %s547_s2 = inlined_call_operand.vmem [shape: f32[1,256], index: 2, kind: input, shape index: {}]   ;;  %s548_s3 = inlined_call_operand.vmem [shape: f32[256,2], index: 3, kind: input, shape index: {}]   ;;  %s549_s4 = inlined_call_operand.vmem [shape: f32[1,2], index: 4, kind: input, shape index: {}]   ;;  %s550_s5 = inlined_call_operand.hbm [shape: f32[2,2], index: 5, kind: output, shape index: {}]  }
   0x1   :  { %v50_v0 = vld [vmem:[%s546_s1 + $0xe0] sm:$0xff]  ;;  %v51_v1 = vld [vmem:[%s546_s1 + $0xe8] sm:$0xff]  ;;  %v165_v14 = vld [vmem:[%s548_s3 + $0x78] sm:$0xff] }
   0x2   :  { %v46_v2 = vld [vmem:[%s546_s1 + $0xc0] sm:$0xff]  ;;  %66 = vmatpush.msra.mxu2 %v50_v0  ;;  %86 = vmatpush.msra.mxu3 %v51_v1  ;;  %v47_v3 = vld [vmem:[%s546_s1 + $0xc8] sm:$0xff]  ;;  %v181_v15 = vld [vmem:[%s548_s3 + $0xf8] sm:$0xff] }
   0x3   :  { %v42_v4 = vld [vmem:[%s546_s1 + $0xa0] sm:$0xff]  ;;  %v43_v5 = vld [vmem:[%s546_s1 + $0xa8] sm:$0xff]  ;;  %v164_v16 = vld [vmem:[%s548_s3 + $0x70] sm:$0xff]  ;;  %186 = vmatpush.msra.mxu0 %v165_v14  ;;  %206 = vmatpush.msra.mxu1 %v181_v15 }
   0x4   :  { %67 = vmatpush.msra.mxu2 %v46_v2  ;;  %87 = vmatpush.msra.mxu3 %v47_v3  ;;  %v38_v6 = vld [vmem:[%s546_s1 + $0x80] sm:$0xff]  ;;  %v39_v7 = vld [vmem:[%s546_s1 + $0x88] sm:$0xff]  ;;  %v180_v19 = vld [vmem:[%s548_s3 + $0xf0] sm:$0xff] }
   0x5   :  { %v34_v8 = vld [vmem:[%s546_s1 + $0x60] sm:$0xff]  ;;  %v35_v9 = vld [vmem:[%s546_s1 + $0x68] sm:$0xff]  ;;  %v52_v20 = vld [vmem:[%s546_s1 + $0xf0] sm:$0xff]  ;;  %187 = vmatpush.msra.mxu0 %v164_v16  ;;  %207 = vmatpush.msra.mxu1 %v180_v19 }
   0x6   :  { %68 = vmatpush.msra.mxu2 %v42_v4  ;;  %88 = vmatpush.msra.mxu3 %v43_v5  ;;  %v30_v10 = vld [vmem:[%s546_s1 + $0x40] sm:$0xff]  ;;  %v31_v11 = vld [vmem:[%s546_s1 + $0x48] sm:$0xff]  ;;  %v53_v21 = vld [vmem:[%s546_s1 + $0xf8] sm:$0xff] }
   0x7   :  { %v26_v12 = vld [vmem:[%s546_s1 + $0x20] sm:$0xff]  ;;  %v27_v13 = vld [vmem:[%s546_s1 + $0x28] sm:$0xff]  ;;  %v48_v23 = vld [vmem:[%s546_s1 + $0xd0] sm:$0xff] }
   0x8   :  { %69 = vmatpush.msra.mxu2 %v38_v6  ;;  %89 = vmatpush.msra.mxu3 %v39_v7  ;;  %v22_v17 = vld [vmem:[%s546_s1] sm:$0xff]  ;;  %v23_v18 = vld [vmem:[%s546_s1 + $0x8] sm:$0xff]  ;;  %v49_v24 = vld [vmem:[%s546_s1 + $0xd8] sm:$0xff] }
   0x9   :  { %v400_v22 = vld [vmem:[%s545_s0] sm:$0x3]  ;;  %v163_v25 = vld [vmem:[%s548_s3 + $0x68] sm:$0xff] }
   0xa   :  { %70 = vmatpush.msra.mxu2 %v34_v8  ;;  %90 = vmatpush.msra.mxu3 %v35_v9  ;;  %v179_v26 = vld [vmem:[%s548_s3 + $0xe8] sm:$0xff] }
   0xc   :  { %71 = vmatpush.msra.mxu2 %v30_v10  ;;  %91 = vmatpush.msra.mxu3 %v31_v11 }
   0xe   :  { %72 = vmatpush.msra.mxu2 %v26_v12  ;;  %92 = vmatpush.msra.mxu3 %v27_v13 }
  0x10   :  { %73 = vmatpush.msra.mxu2 %v22_v17  ;;  %93 = vmatpush.msra.mxu3 %v23_v18 }
  0x12   :  { %106 = vmatpush.msrb.mxu2 %v52_v20  ;;  %126 = vmatpush.msrb.mxu3 %v53_v21 }
  0x13   :  { %10 = vsyncpa [#allocation3], 0  ;;  %v44_v27 = vld [vmem:[%s546_s1 + $0xb0] sm:$0xff]  ;;  %v45_v28 = vld [vmem:[%s546_s1 + $0xb8] sm:$0xff]  ;;  %263 = vmatmul.msk.f32.vlgmr.msra.gmra.mxu2 %vm54_vm0, %v400_v22  ;;  %264 = vmatmul.msk.f32.vlgmr.msra.gmra.mxu3 %vm54_vm0, %v400_v22  ;;  %s254_s22 = sshll.u32 %s550_s5, 4  ;;  %vm245_vm4 = vcmask 9216   ;;  %s255_s22 = int_to_ptr.hbm [resolvable:$true] %s254_s22 }
  0x14   :  { %107 = vmatpush.msrb.mxu2 %v48_v23  ;;  %127 = vmatpush.msrb.mxu3 %v49_v24  ;;  %v162_v29 = vld [vmem:[%s548_s3 + $0x60] sm:$0xff]  ;;  %v40_v31 = vld [vmem:[%s546_s1 + $0x90] sm:$0xff]  ;;  %v41_v32 = vld [vmem:[%s546_s1 + $0x98] sm:$0xff] }
  0x15   :  { %v178_v30 = vld [vmem:[%s548_s3 + $0xe0] sm:$0xff]  ;;  %188 = vmatpush.msra.mxu0 %v163_v25  ;;  %208 = vmatpush.msra.mxu1 %v179_v26  ;;  %v161_v33 = vld [vmem:[%s548_s3 + $0x58] sm:$0xff]  ;;  %v36_v35 = vld [vmem:[%s546_s1 + $0x70] sm:$0xff] }
  0x16   :  { %108 = vmatpush.msrb.mxu2 %v44_v27  ;;  %128 = vmatpush.msrb.mxu3 %v45_v28  ;;  %v177_v34 = vld [vmem:[%s548_s3 + $0xd8] sm:$0xff]  ;;  %v160_v37 = vld [vmem:[%s548_s3 + $0x50] sm:$0xff]  ;;  %v159_v41 = vld [vmem:[%s548_s3 + $0x48] sm:$0xff] }
  0x17   :  { %v37_v36 = vld [vmem:[%s546_s1 + $0x78] sm:$0xff]  ;;  %189 = vmatpush.msra.mxu0 %v162_v29  ;;  %209 = vmatpush.msra.mxu1 %v178_v30  ;;  %v176_v38 = vld [vmem:[%s548_s3 + $0xd0] sm:$0xff]  ;;  %v175_v42 = vld [vmem:[%s548_s3 + $0xc8] sm:$0xff] }
  0x18   :  { %109 = vmatpush.msrb.mxu2 %v40_v31  ;;  %129 = vmatpush.msrb.mxu3 %v41_v32  ;;  %v32_v39 = vld [vmem:[%s546_s1 + $0x50] sm:$0xff]  ;;  %v33_v40 = vld [vmem:[%s546_s1 + $0x58] sm:$0xff]  ;;  %v158_v45 = vld [vmem:[%s548_s3 + $0x40] sm:$0xff] }
  0x19   :  { %190 = vmatpush.msra.mxu0 %v161_v33  ;;  %210 = vmatpush.msra.mxu1 %v177_v34  ;;  %v28_v43 = vld [vmem:[%s546_s1 + $0x30] sm:$0xff]  ;;  %v29_v44 = vld [vmem:[%s546_s1 + $0x38] sm:$0xff]  ;;  %v174_v46 = vld [vmem:[%s548_s3 + $0xc0] sm:$0xff] }
  0x1a   :  { %110 = vmatpush.msrb.mxu2 %v36_v35  ;;  %130 = vmatpush.msrb.mxu3 %v37_v36  ;;  %v24_v47 = vld [vmem:[%s546_s1 + $0x10] sm:$0xff]  ;;  %v25_v48 = vld [vmem:[%s546_s1 + $0x18] sm:$0xff]  ;;  %v155_v53 = vld [vmem:[%s548_s3 + $0x28] sm:$0xff] }
  0x1b   :  { %191 = vmatpush.msra.mxu0 %v160_v37  ;;  %211 = vmatpush.msra.mxu1 %v176_v38  ;;  %v157_v49 = vld [vmem:[%s548_s3 + $0x38] sm:$0xff]  ;;  %v156_v51 = vld [vmem:[%s548_s3 + $0x30] sm:$0xff]  ;;  %v171_v54 = vld [vmem:[%s548_s3 + $0xa8] sm:$0xff] }
  0x1c   :  { %111 = vmatpush.msrb.mxu2 %v32_v39  ;;  %131 = vmatpush.msrb.mxu3 %v33_v40  ;;  %v173_v50 = vld [vmem:[%s548_s3 + $0xb8] sm:$0xff]  ;;  %v172_v52 = vld [vmem:[%s548_s3 + $0xb0] sm:$0xff]  ;;  %v154_v55 = vld [vmem:[%s548_s3 + $0x20] sm:$0xff] }
  0x1d   :  { %192 = vmatpush.msra.mxu0 %v159_v41  ;;  %212 = vmatpush.msra.mxu1 %v175_v42  ;;  %v170_v56 = vld [vmem:[%s548_s3 + $0xa0] sm:$0xff]  ;;  %v153_v57 = vld [vmem:[%s548_s3 + $0x18] sm:$0xff]  ;;  %v152_v59 = vld [vmem:[%s548_s3 + $0x10] sm:$0xff] }
  0x1e   :  { %112 = vmatpush.msrb.mxu2 %v28_v43  ;;  %132 = vmatpush.msrb.mxu3 %v29_v44  ;;  %v169_v58 = vld [vmem:[%s548_s3 + $0x98] sm:$0xff]  ;;  %v168_v60 = vld [vmem:[%s548_s3 + $0x90] sm:$0xff]  ;;  %v151_v61 = vld [vmem:[%s548_s3 + $0x8] sm:$0xff] }
  0x1f   :  { %193 = vmatpush.msra.mxu0 %v158_v45  ;;  %213 = vmatpush.msra.mxu1 %v174_v46  ;;  %v167_v62 = vld [vmem:[%s548_s3 + $0x88] sm:$0xff]  ;;  %v150_v63 = vld [vmem:[%s548_s3] sm:$0xff] }
  0x20   :  { %113 = vmatpush.msrb.mxu2 %v24_v47  ;;  %133 = vmatpush.msrb.mxu3 %v25_v48  ;;  %v166_v0 = vld [vmem:[%s548_s3 + $0x80] sm:$0xff] }
  0x21   :  { %265 = vmatmul.msk.f32.vlgmr.msrb.gmra.mxu2 %vm54_vm0, %v400_v22  ;;  %266 = vmatmul.msk.f32.vlgmr.msrb.gmra.mxu3 %vm54_vm0, %v400_v22  ;;  %v140_v3 = vld [vmem:[%s547_s2] sm:$0x3]  ;;  %s300_s2 = smov [#allocation2]  }
  0x22   :  { %194 = vmatpush.msra.mxu0 %v157_v49  ;;  %214 = vmatpush.msra.mxu1 %v173_v50  ;;  %v142_v4 = vperm.slane %v140_v3, 0  ;;  %v143_v5 = vperm.slane %v140_v3, 1  ;;  %v269_v14 = vld [vmem:[%s549_s4] ss:$0 sm:$0xff]  ;;  %s252_s20 = sshll.u32 %s300_s2, 4  ;;  %s253_s20 = int_to_ptr.vmem [resolvable:$true] %s252_s20 }
  0x24   :  { %195 = vmatpush.msra.mxu0 %v156_v51  ;;  %215 = vmatpush.msra.mxu1 %v172_v52 }
  0x26   :  { %196 = vmatpush.msra.mxu0 %v155_v53  ;;  %216 = vmatpush.msra.mxu1 %v171_v54 }
  0x28   :  { %197 = vmatpush.msra.mxu0 %v154_v55  ;;  %217 = vmatpush.msra.mxu1 %v170_v56 }
  0x2a   :  { %198 = vmatpush.msra.mxu0 %v153_v57  ;;  %218 = vmatpush.msra.mxu1 %v169_v58 }
  0x2c   :  { %199 = vmatpush.msra.mxu0 %v152_v59  ;;  %219 = vmatpush.msra.mxu1 %v168_v60 }
  0x2e   :  { %200 = vmatpush.msra.mxu0 %v151_v61  ;;  %220 = vmatpush.msra.mxu1 %v167_v62 }
  0x30   :  { %201 = vmatpush.msra.mxu0 %v150_v63  ;;  %221 = vmatpush.msra.mxu1 %v166_v0 }
  0x96   :  { %v75_v1 = vpop.f32.mrf.mxu2  ;;  %v95_v2 = vpop.f32.mrf.mxu3 }
  0xa4   :  { %v115_v6 = vpop.f32.mrf.mxu2  ;;  %v135_v7 = vpop.f32.mrf.mxu3 }
  0xa5   :  { %v138_v8 = vmax.f32 %v75_v1, %v115_v6  ;;  %v139_v9 = vmax.f32 %v95_v2, %v135_v7 }
  0xa7   :  { %v146_v10 = vadd.f32 %v142_v4, %v138_v8  ;;  %v147_v11 = vadd.f32 %v143_v5, %v139_v9 }
  0xa9   :  { %v148_v12 = vmax.f32 %v146_v10, 0.0  ;;  %v149_v13 = vmax.f32 %v147_v11, 0.0 }
  0xab   :  { %202 = vmatmul.f32.vlgmr.msra.gmra.mxu0 %v148_v12  ;;  %222 = vmatmul.f32.vlgmr.msra.gmra.mxu1 %v149_v13 }
 0x128   :  { %v203_v15 = vpop.f32.mrf.mxu0  ;;  %v223_v17 = vpop.f32.mrf.mxu1 }
 0x129   :  { %v204_v16 = vadd.f32 %v269_v14, %v203_v15 }
 0x12b   :  { %v224_v18 = vadd.f32 %v223_v17, %v204_v16 }
 0x12d   :  { %v267_v19 = vmul.f32 -1.442695, %v224_v18 }
 0x12f   :  { %270 = vpow2.f32 %v267_v19 }
 0x135   :  { %v271_v20 = vpop.eup %270 }
 0x136   :  { %v229_v21 = vadd.f32 1.0, %v271_v20 }
 0x138   :  { %272 = vrcp.f32 %v229_v21  ;;  %v241_v25 = vand.u32 2147483648, %v229_v21  ;;  %v239_v27 = vand.u32 2147483647, %v229_v21  ;;  %vm235_vm2 = vweird.f32 %v229_v21 }
 0x13a   :  { %v242_v29 = vor.u32 1.1754944e-38, %v241_v25  ;;  %vm240_vm5 = vcmp.eq.f32.partialorder %v239_v27, 8.507059e+37 }
 0x13e   :  { %v273_v22 = vpop.eup %272 }
 0x13f   :  { %v231_v23 = vmul.f32 %v273_v22, %v229_v21  ;;  %vm236_vm1 = vweird.f32 %v273_v22 }
 0x140   :  { %vm237_vm3 = vmor %vm235_vm2, %vm236_vm1 }
 0x141   :  { %v232_v24 = vsub.f32 1.0, %v231_v23 }
 0x143   :  { %v233_v26 = vmul.f32 %v273_v22, %v232_v24 }
 0x145   :  { %v234_v28 = vadd.f32 %v273_v22, %v233_v26 }
 0x147   :  { %v238_v30 = vsel %vm237_vm3, %v273_v22, %v234_v28 }
 0x148   :  { %v243_v31 = vsel %vm240_vm5, %v242_v29, %v238_v30 }
 0x149   :  { %246 = vst.msk [vmem:[#allocation2] sm:$0x3] %vm245_vm4, %v243_v31 }
 0x14a   :  { %257 = dma.vmem_to_hbm [thread:$0]  %s253_s20, 32, %s255_s22, [#allocation3]  }
 0x14b   :  { %298 = dma.done.wait [#allocation3], 32  }
 0x14c   :  { %299 = vsyncadd [#allocation3], 4294967264 }
 0x14d   :  { %262 = vsyncpa [#allocation3], 1 }

</bundles_post_ra>
